<compile_context>
chip_gen: v7x
topology: tpu7x:2x2x1
jax: 0.10.0
libtpu: 0.0.40
codegen_flags: <defaults>
</compile_context>

<pallas_src>
import jax
import jax.numpy as jnp
from jax import lax
from jax.experimental import pallas as pl
from jax.experimental.pallas import tpu as pltpu


def _bottleneck_kernel(x_ref, w1_ref, b1_ref, w2_ref, b2_ref, w3_ref, b3_ref,
                       o_ref):
    # x_ref : (1, 1, TH+2, W, Cin) f32 haloed row tile (halo rows gathered
    #         host-side; out-of-image halo rows are zero in x but must be
    #         zeroed again *after* conv1+BN+ReLU -- see mask below).
    # w*_ref: BN-scale-folded conv weights, bf16.   b*_ref: BN shifts, f32.
    _, _, THp2, W, Cin = x_ref.shape
    TH = THp2 - 2
    P = w1_ref.shape[1]
    Cout = o_ref.shape[-1]
    Mh = THp2 * W          # rows incl. halo
    M = TH * W             # output rows of this tile
    f32, bf16 = jnp.float32, jnp.bfloat16

    # ---- conv1 (1x1) + BN1 + ReLU (halo rows recomputed; 1x1 -> cheap) -----
    xh = x_ref[0, 0]                                          # (TH+2, W, Cin)
    h1 = jnp.dot(xh.reshape(Mh, Cin).astype(bf16), w1_ref[...],
                 preferred_element_type=f32)
    h1 = jnp.maximum(h1 + b1_ref[...], 0.0)                   # (Mh, P) f32
    h1 = h1.reshape(THp2, W, P)

    # 3x3 SAME padding is zero in *h1* space (not relu(b1)); zero any halo
    # row that falls outside the image.
    t = pl.program_id(1)
    h_total = pl.num_programs(1) * TH
    row = lax.broadcasted_iota(jnp.int32, (THp2, 1, 1), 0) + t * TH - 1
    h1 = jnp.where((row >= 0) & (row < h_total), h1, 0.0)

    # ---- conv2 (3x3, stride=1, pad=1) + BN2 + ReLU --------------------------
    # im2col over the kx taps: lane block kx of the LHS holds h1 shifted by
    # (kx-1) along W, so each ky is a single (M, 3P) x (3P, P) MXU matmul.
    zc = jnp.zeros((THp2, 1, P), f32)
    hcat = jnp.concatenate(
        [jnp.concatenate([zc, h1[:, :W - 1, :]], axis=1),     # kx=0 : j-1
         h1,                                                  # kx=1 : j
         jnp.concatenate([h1[:, 1:, :], zc], axis=1)],        # kx=2 : j+1
        axis=-1).astype(bf16)                                 # (TH+2, W, 3P)

    acc = jnp.dot(hcat[0:TH].reshape(M, 3 * P), w2_ref[0],
                  preferred_element_type=f32)
    for ky in (1, 2):                                         # rows i+ky-1
        win = hcat[ky:ky + TH].reshape(M, 3 * P)
        acc = acc + jnp.dot(win, w2_ref[ky], preferred_element_type=f32)
    h2 = jnp.maximum(acc + b2_ref[...], 0.0)                  # (M, P) f32

    # ---- conv3 (1x1) + BN3 + residual + ReLU --------------------------------
    y = jnp.dot(h2.astype(bf16), w3_ref[...], preferred_element_type=f32)
    y = y + b3_ref[...]
    # Residual = the un-haloed input rows of this tile, re-read from VMEM.
    res = x_ref[0, 0, pl.ds(1, TH)].reshape(M, Cin)
    y = jnp.maximum(y + res, 0.0)
    o_ref[0] = y.reshape(TH, W, Cout).astype(o_ref.dtype)


def fold_bn(gamma, beta, mean, var, eps=1e-5):
    """Inference-mode BatchNorm -> per-channel (scale, shift)."""
    scale = gamma / jnp.sqrt(var + eps)
    shift = beta - mean * scale
    return scale, shift


def bottleneck_forward(x, w1, s1, b1, w2, s2, b2, w3, s3, b3, *, row_tile=4):
    """x: (B,H,W,Cin) NHWC; w1:(Cin,P); w2:(3,3,P,P) HWIO; w3:(P,Cout);
    s*/b*: folded BN scale/shift. Returns relu(bn3(conv3(...)) + x)."""
    B, H, W, Cin = x.shape
    P = w1.shape[1]
    Cout = w3.shape[1]
    assert Cout == Cin, "downsample=None requires inplanes == planes*expansion"
    assert W % 8 == 0, "W must be a sublane multiple (free in-kernel reshapes)"
    assert H % row_tile == 0, "row_tile must divide H"
    TH = row_tile
    nT = H // TH

    f32, bf16 = jnp.float32, jnp.bfloat16

    # Fold BN scales into the conv weights (bf16 MXU operands, f32 shifts).
    w1f = (w1 * s1[None, :]).astype(bf16)                             # (Cin,P)
    w2f = (w2 * s2[None, None, None, :]).reshape(3, 3 * P, P).astype(bf16)
    w3f = (w3 * s3[None, :]).astype(bf16)                             # (P,Cout)
    b1r = b1.reshape(1, P).astype(f32)
    b2r = b2.reshape(1, P).astype(f32)
    b3r = b3.reshape(1, Cout).astype(f32)

    # Haloed row tiles: x_halo[b, t] = zero-padded x rows [t*TH-1, t*TH+TH].
    xp = jnp.pad(x, ((0, 0), (1, 1), (0, 0), (0, 0)))
    x_halo = jnp.stack([xp[:, t * TH:t * TH + TH + 2] for t in range(nT)],
                       axis=1)                               # (B,nT,TH+2,W,Cin)

    # Honest (lane-padded) VMEM estimate, capped v7x-safe at 32 MiB.
    lane = lambda c: -(-c // 128) * 128
    tile_in = (TH + 2) * W * lane(Cin) * 4
    tile_out = TH * W * lane(Cout) * 4
    weights = 2 * (Cin * lane(P) + 9 * P * lane(P) + P * lane(Cout)) \
        + 4 * 8 * (2 * lane(P) + lane(Cout))
    interm = (TH + 2) * W * (lane(P) * 4 + lane(3 * P) * 6) \
        + TH * W * (2 * lane(P) + 2 * lane(Cout)) * 4
    vmem_budget = 2 * (tile_in + tile_out + weights) + interm
    vmem_budget = int(min(max(2 * vmem_budget, 4 * 2**20), 32 * 2**20))

    flops = 2 * B * H * W * (Cin * P + 9 * P * P + P * Cout)
    bytes_accessed = int((x_halo.size + B * H * W * Cout) * 4
                         + 2 * (w1f.size + w2f.size + w3f.size))

    return pl.pallas_call(
        _bottleneck_kernel,
        out_shape=jax.ShapeDtypeStruct((B, H, W, Cout), x.dtype),
        grid_spec=pltpu.PrefetchScalarGridSpec(
            num_scalar_prefetch=0,
            grid=(B, nT),
            in_specs=[
                pl.BlockSpec((1, 1, TH + 2, W, Cin),
                             lambda b, t: (b, t, 0, 0, 0)),           # x halo
                pl.BlockSpec((Cin, P), lambda b, t: (0, 0)),          # w1*s1
                pl.BlockSpec((1, P), lambda b, t: (0, 0)),            # bn1 shift
                pl.BlockSpec((3, 3 * P, P), lambda b, t: (0, 0, 0)),  # w2*s2
                pl.BlockSpec((1, P), lambda b, t: (0, 0)),            # bn2 shift
                pl.BlockSpec((P, Cout), lambda b, t: (0, 0)),         # w3*s3
                pl.BlockSpec((1, Cout), lambda b, t: (0, 0)),         # bn3 shift
            ],
            out_specs=pl.BlockSpec((1, TH, W, Cout),
                                   lambda b, t: (b, t, 0, 0)),
        ),
        compiler_params=pltpu.CompilerParams(
            dimension_semantics=("parallel", "parallel"),
            vmem_limit_bytes=vmem_budget),
        cost_estimate=pl.CostEstimate(
            flops=flops, transcendentals=0, bytes_accessed=bytes_accessed),
    )(x_halo, w1f, b1r, w2f, b2r, w3f, b3r)


def bottleneck_ref(x, w1, bn1, w2, bn2, w3, bn3, eps=1e-5):
    """Pure-JAX reference (eval-mode BN), NHWC / HWIO, full f32 precision."""
    def bn(h, p):
        g, b, m, v = p
        return (h - m) * (g / jnp.sqrt(v + eps)) + b
    hp = lax.Precision.HIGHEST
    h = jnp.einsum('nhwc,cd->nhwd', x, w1, precision=hp)
    h = jax.nn.relu(bn(h, bn1))
    h = lax.conv_general_dilated(h, w2, (1, 1), 'SAME',
                                 dimension_numbers=('NHWC', 'HWIO', 'NHWC'),
                                 precision=hp)
    h = jax.nn.relu(bn(h, bn2))
    h = jnp.einsum('nhwc,cd->nhwd', h, w3, precision=hp)
    h = bn(h, bn3)
    return jax.nn.relu(h + x)


if __name__ == "__main__":
    # Bottleneck with planes=32, expansion=4 -> inplanes = out channels = 128
    # (lane-dense residual path), spatial 16x16, batch 2, stride=1,
    # downsample=None.  Grid = (2 batches x 4 row tiles) = 8 steps.
    B, Hs, Ws = 2, 16, 16
    planes = 32
    inplanes = planes * 4
    cout = planes * 4
    eps = 1e-5

    key = jax.random.PRNGKey(0)
    ks = jax.random.split(key, 8)

    x = jax.random.normal(ks[0], (B, Hs, Ws, inplanes), dtype=jnp.float32)

    # Conv weights (Kaiming-ish scaling). conv1/conv3 as (Cin, Cout) matrices,
    # conv2 in HWIO layout (3, 3, Cin, Cout).
    w1 = jax.random.normal(ks[1], (inplanes, planes), jnp.float32) / jnp.sqrt(inplanes)
    w2 = jax.random.normal(ks[2], (3, 3, planes, planes), jnp.float32) / jnp.sqrt(9 * planes)
    w3 = jax.random.normal(ks[3], (planes, cout), jnp.float32) / jnp.sqrt(planes)

    def bn_params(k, c):
        k1, k2, k3, k4 = jax.random.split(k, 4)
        gamma = 1.0 + 0.1 * jax.random.normal(k1, (c,), jnp.float32)
        beta = 0.1 * jax.random.normal(k2, (c,), jnp.float32)
        mean = 0.1 * jax.random.normal(k3, (c,), jnp.float32)
        var = jax.nn.softplus(jax.random.normal(k4, (c,), jnp.float32)) + 0.5
        return gamma, beta, mean, var

    bn1 = bn_params(ks[4], planes)
    bn2 = bn_params(ks[5], planes)
    bn3 = bn_params(ks[6], cout)

    s1, sh1 = fold_bn(*bn1, eps)
    s2, sh2 = fold_bn(*bn2, eps)
    s3, sh3 = fold_bn(*bn3, eps)

    out = bottleneck_forward(x, w1, s1, sh1, w2, s2, sh2, w3, s3, sh3,
                             row_tile=4)
    jax.block_until_ready(out)

    ref = bottleneck_ref(x, w1, bn1, w2, bn2, w3, bn3, eps)
    assert out.shape == ref.shape and out.dtype == x.dtype
    max_err = float(jnp.max(jnp.abs(out - ref)))
    # bf16 matmul operands with f32 accumulation: expect ~1e-2 max abs error.
    assert jnp.allclose(out, ref, atol=8e-2, rtol=5e-2), max_err

    print("KERNEL_OK")
</pallas_src>

<mosaic_0001>
module attributes {stable_mosaic.version = 11 : i64} {
  func.func @_bottleneck_kernel(%arg0: i32, %arg1: i32, %arg2: memref<1x1x6x16x128xf32, #tpu.memory_space<vmem>>, %arg3: memref<128x32xbf16, #tpu.memory_space<vmem>>, %arg4: memref<1x32xf32, #tpu.memory_space<vmem>>, %arg5: memref<3x96x32xbf16, #tpu.memory_space<vmem>>, %arg6: memref<1x32xf32, #tpu.memory_space<vmem>>, %arg7: memref<32x128xbf16, #tpu.memory_space<vmem>>, %arg8: memref<1x128xf32, #tpu.memory_space<vmem>>, %arg9: memref<1x4x16x128xf32, #tpu.memory_space<vmem>>) attributes {dimension_semantics = [#tpu.dimension_semantics<parallel>, #tpu.dimension_semantics<parallel>], iteration_bounds = array<i64: 2, 4>, scalar_prefetch = 0 : i64, scratch_operands = 0 : i64, tpu.core_type = #tpu.core_type<tc>, window_params = [{transform_indices = @transform_0, window_bounds = array<i64: 1, 1, 6, 16, 128>}, {pipeline_mode = #tpu.pipeline_mode<synchronous>, transform_indices = @transform_1, window_bounds = array<i64: 128, 32>}, {pipeline_mode = #tpu.pipeline_mode<synchronous>, transform_indices = @transform_2, window_bounds = array<i64: 1, 32>}, {pipeline_mode = #tpu.pipeline_mode<synchronous>, transform_indices = @transform_3, window_bounds = array<i64: 3, 96, 32>}, {pipeline_mode = #tpu.pipeline_mode<synchronous>, transform_indices = @transform_4, window_bounds = array<i64: 1, 32>}, {pipeline_mode = #tpu.pipeline_mode<synchronous>, transform_indices = @transform_5, window_bounds = array<i64: 32, 128>}, {pipeline_mode = #tpu.pipeline_mode<synchronous>, transform_indices = @transform_6, window_bounds = array<i64: 1, 128>}, {transform_indices = @transform_7, window_bounds = array<i64: 1, 4, 16, 128>}]} {
    %c0 = arith.constant 0 : index
    %c0_0 = arith.constant 0 : index
    %c0_1 = arith.constant 0 : index
    %c0_2 = arith.constant 0 : index
    %c0_3 = arith.constant 0 : index
    %0 = vector.load %arg2[%c0, %c0_0, %c0_1, %c0_2, %c0_3] : memref<1x1x6x16x128xf32, #tpu.memory_space<vmem>>, vector<1x1x6x16x128xf32>
    %1 = vector.shape_cast %0 : vector<1x1x6x16x128xf32> to vector<6x16x128xf32>
    %2 = vector.shape_cast %1 : vector<6x16x128xf32> to vector<96x128xf32>
    %3 = arith.truncf %2 : vector<96x128xf32> to vector<96x128xbf16>
    %c0_4 = arith.constant 0 : index
    %c0_5 = arith.constant 0 : index
    %4 = vector.load %arg3[%c0_4, %c0_5] : memref<128x32xbf16, #tpu.memory_space<vmem>>, vector<128x32xbf16>
    %cst = arith.constant dense<0.000000e+00> : vector<96x32xf32>
    %5 = tpu.matmul %3, %4, %cst {dimension_numbers = #tpu.dot_dimension_numbers<[1], [0], [0], [1], [0, 0, 1, 1], [], []>} : vector<96x128xbf16>, vector<128x32xbf16>, vector<96x32xf32> -> vector<96x32xf32>
    %c0_6 = arith.constant 0 : index
    %c0_7 = arith.constant 0 : index
    %6 = vector.load %arg4[%c0_6, %c0_7] : memref<1x32xf32, #tpu.memory_space<vmem>>, vector<1x32xf32>
    %7 = vector.broadcast %6 : vector<1x32xf32> to vector<96x32xf32>
    %8 = arith.addf %5, %7 : vector<96x32xf32>
    %cst_8 = arith.constant 0.000000e+00 : f32
    %9 = vector.broadcast %cst_8 : f32 to vector<96x32xf32>
    %10 = arith.maximumf %8, %9 : vector<96x32xf32>
    %11 = vector.shape_cast %10 : vector<96x32xf32> to vector<6x16x32xf32>
    %12 = tpu.iota {dimensions = array<i32: 0>} : vector<6x1x1xi32>
    %c4_i32 = arith.constant 4 : i32
    %13 = arith.muli %arg1, %c4_i32 : i32
    %14 = vector.broadcast %13 : i32 to vector<6x1x1xi32>
    %15 = arith.addi %12, %14 : vector<6x1x1xi32>
    %c1_i32 = arith.constant 1 : i32
    %16 = vector.broadcast %c1_i32 : i32 to vector<6x1x1xi32>
    %17 = arith.subi %15, %16 : vector<6x1x1xi32>
    %c0_i32 = arith.constant 0 : i32
    %18 = vector.broadcast %c0_i32 : i32 to vector<6x1x1xi32>
    %19 = arith.cmpi sge, %17, %18 : vector<6x1x1xi32>
    %c16_i32 = arith.constant 16 : i32
    %20 = vector.broadcast %c16_i32 : i32 to vector<6x1x1xi32>
    %21 = arith.cmpi slt, %17, %20 : vector<6x1x1xi32>
    %22 = arith.andi %19, %21 : vector<6x1x1xi1>
    %cst_9 = arith.constant 0.000000e+00 : f32
    %23 = vector.shape_cast %22 : vector<6x1x1xi1> to vector<6x1x1xi1>
    %24 = vector.broadcast %23 : vector<6x1x1xi1> to vector<6x16x32xi1>
    %25 = vector.broadcast %cst_9 : f32 to vector<6x16x32xf32>
    %26 = arith.select %24, %11, %25 : vector<6x16x32xi1>, vector<6x16x32xf32>
    %cst_10 = arith.constant 0.000000e+00 : f32
    %27 = vector.broadcast %cst_10 : f32 to vector<6x1x32xf32>
    %28 = vector.extract_strided_slice %26 {offsets = [0, 0, 0], sizes = [6, 15, 32], strides = [1, 1, 1]} : vector<6x16x32xf32> to vector<6x15x32xf32>
    %29 = tpu.concatenate %27, %28 in 1 : vector<6x1x32xf32>, vector<6x15x32xf32> -> vector<6x16x32xf32>
    %30 = vector.extract_strided_slice %26 {offsets = [0, 1, 0], sizes = [6, 15, 32], strides = [1, 1, 1]} : vector<6x16x32xf32> to vector<6x15x32xf32>
    %31 = tpu.concatenate %30, %27 in 1 : vector<6x15x32xf32>, vector<6x1x32xf32> -> vector<6x16x32xf32>
    %32 = tpu.concatenate %29, %26, %31 in 2 : vector<6x16x32xf32>, vector<6x16x32xf32>, vector<6x16x32xf32> -> vector<6x16x96xf32>
    %33 = arith.truncf %32 : vector<6x16x96xf32> to vector<6x16x96xbf16>
    %34 = vector.extract_strided_slice %33 {offsets = [0, 0, 0], sizes = [4, 16, 96], strides = [1, 1, 1]} : vector<6x16x96xbf16> to vector<4x16x96xbf16>
    %35 = vector.shape_cast %34 : vector<4x16x96xbf16> to vector<64x96xbf16>
    %c0_11 = arith.constant 0 : index
    %c0_12 = arith.constant 0 : index
    %c0_13 = arith.constant 0 : index
    %36 = vector.load %arg5[%c0_11, %c0_12, %c0_13] : memref<3x96x32xbf16, #tpu.memory_space<vmem>>, vector<1x96x32xbf16>
    %37 = vector.shape_cast %36 : vector<1x96x32xbf16> to vector<96x32xbf16>
    %cst_14 = arith.constant dense<0.000000e+00> : vector<64x32xf32>
    %38 = tpu.matmul %35, %37, %cst_14 {dimension_numbers = #tpu.dot_dimension_numbers<[1], [0], [0], [1], [0, 0, 1, 1], [], []>} : vector<64x96xbf16>, vector<96x32xbf16>, vector<64x32xf32> -> vector<64x32xf32>
    %39 = vector.extract_strided_slice %33 {offsets = [1, 0, 0], sizes = [4, 16, 96], strides = [1, 1, 1]} : vector<6x16x96xbf16> to vector<4x16x96xbf16>
    %40 = vector.shape_cast %39 : vector<4x16x96xbf16> to vector<64x96xbf16>
    %c1 = arith.constant 1 : index
    %c0_15 = arith.constant 0 : index
    %c0_16 = arith.constant 0 : index
    %41 = vector.load %arg5[%c1, %c0_15, %c0_16] : memref<3x96x32xbf16, #tpu.memory_space<vmem>>, vector<1x96x32xbf16>
    %42 = vector.shape_cast %41 : vector<1x96x32xbf16> to vector<96x32xbf16>
    %cst_17 = arith.constant dense<0.000000e+00> : vector<64x32xf32>
    %43 = tpu.matmul %40, %42, %cst_17 {dimension_numbers = #tpu.dot_dimension_numbers<[1], [0], [0], [1], [0, 0, 1, 1], [], []>} : vector<64x96xbf16>, vector<96x32xbf16>, vector<64x32xf32> -> vector<64x32xf32>
    %44 = arith.addf %38, %43 : vector<64x32xf32>
    %45 = vector.extract_strided_slice %33 {offsets = [2, 0, 0], sizes = [4, 16, 96], strides = [1, 1, 1]} : vector<6x16x96xbf16> to vector<4x16x96xbf16>
    %46 = vector.shape_cast %45 : vector<4x16x96xbf16> to vector<64x96xbf16>
    %c2 = arith.constant 2 : index
    %c0_18 = arith.constant 0 : index
    %c0_19 = arith.constant 0 : index
    %47 = vector.load %arg5[%c2, %c0_18, %c0_19] : memref<3x96x32xbf16, #tpu.memory_space<vmem>>, vector<1x96x32xbf16>
    %48 = vector.shape_cast %47 : vector<1x96x32xbf16> to vector<96x32xbf16>
    %cst_20 = arith.constant dense<0.000000e+00> : vector<64x32xf32>
    %49 = tpu.matmul %46, %48, %cst_20 {dimension_numbers = #tpu.dot_dimension_numbers<[1], [0], [0], [1], [0, 0, 1, 1], [], []>} : vector<64x96xbf16>, vector<96x32xbf16>, vector<64x32xf32> -> vector<64x32xf32>
    %50 = arith.addf %44, %49 : vector<64x32xf32>
    %c0_21 = arith.constant 0 : index
    %c0_22 = arith.constant 0 : index
    %51 = vector.load %arg6[%c0_21, %c0_22] : memref<1x32xf32, #tpu.memory_space<vmem>>, vector<1x32xf32>
    %52 = vector.broadcast %51 : vector<1x32xf32> to vector<64x32xf32>
    %53 = arith.addf %50, %52 : vector<64x32xf32>
    %cst_23 = arith.constant 0.000000e+00 : f32
    %54 = vector.broadcast %cst_23 : f32 to vector<64x32xf32>
    %55 = arith.maximumf %53, %54 : vector<64x32xf32>
    %56 = arith.truncf %55 : vector<64x32xf32> to vector<64x32xbf16>
    %c0_24 = arith.constant 0 : index
    %c0_25 = arith.constant 0 : index
    %57 = vector.load %arg7[%c0_24, %c0_25] : memref<32x128xbf16, #tpu.memory_space<vmem>>, vector<32x128xbf16>
    %cst_26 = arith.constant dense<0.000000e+00> : vector<64x128xf32>
    %58 = tpu.matmul %56, %57, %cst_26 {dimension_numbers = #tpu.dot_dimension_numbers<[1], [0], [0], [1], [0, 0, 1, 1], [], []>} : vector<64x32xbf16>, vector<32x128xbf16>, vector<64x128xf32> -> vector<64x128xf32>
    %c0_27 = arith.constant 0 : index
    %c0_28 = arith.constant 0 : index
    %59 = vector.load %arg8[%c0_27, %c0_28] : memref<1x128xf32, #tpu.memory_space<vmem>>, vector<1x128xf32>
    %60 = vector.broadcast %59 : vector<1x128xf32> to vector<64x128xf32>
    %61 = arith.addf %58, %60 : vector<64x128xf32>
    %c0_29 = arith.constant 0 : index
    %c0_30 = arith.constant 0 : index
    %c1_31 = arith.constant 1 : index
    %c0_32 = arith.constant 0 : index
    %c0_33 = arith.constant 0 : index
    %62 = vector.load %arg2[%c0_29, %c0_30, %c1_31, %c0_32, %c0_33] : memref<1x1x6x16x128xf32, #tpu.memory_space<vmem>>, vector<1x1x4x16x128xf32>
    %63 = vector.shape_cast %62 : vector<1x1x4x16x128xf32> to vector<4x16x128xf32>
    %64 = vector.shape_cast %63 : vector<4x16x128xf32> to vector<64x128xf32>
    %65 = arith.addf %61, %64 : vector<64x128xf32>
    %cst_34 = arith.constant 0.000000e+00 : f32
    %66 = vector.broadcast %cst_34 : f32 to vector<64x128xf32>
    %67 = arith.maximumf %65, %66 : vector<64x128xf32>
    %68 = vector.shape_cast %67 : vector<64x128xf32> to vector<4x16x128xf32>
    %c0_35 = arith.constant 0 : index
    %c0_36 = arith.constant 0 : index
    %c0_37 = arith.constant 0 : index
    %c0_38 = arith.constant 0 : index
    %69 = vector.load %arg9[%c0_35, %c0_36, %c0_37, %c0_38] : memref<1x4x16x128xf32, #tpu.memory_space<vmem>>, vector<1x4x16x128xf32>
    %70 = vector.shape_cast %69 : vector<1x4x16x128xf32> to vector<4x16x128xf32>
    %71 = vector.shape_cast %68 : vector<4x16x128xf32> to vector<1x4x16x128xf32>
    tpu.vector_store %arg9[%c0_35, %c0_36, %c0_37, %c0_38], %71 {strides = array<i32>} : memref<1x4x16x128xf32, #tpu.memory_space<vmem>>, vector<1x4x16x128xf32>,
    return
  }
  func.func @transform_0(%arg0: i32, %arg1: i32) -> (i32, i32, i32, i32, i32) {
    %c0_i32 = arith.constant 0 : i32
    %c0_i32_0 = arith.constant 0 : i32
    %c0_i32_1 = arith.constant 0 : i32
    %c0_i32_2 = arith.constant 0 : i32
    return %arg0, %arg1, %c0_i32, %c0_i32_0, %c0_i32_1 : i32, i32, i32, i32, i32
  }
  func.func @transform_1(%arg0: i32, %arg1: i32) -> (i32, i32) {
    %c0_i32 = arith.constant 0 : i32
    %c0_i32_0 = arith.constant 0 : i32
    %c0_i32_1 = arith.constant 0 : i32
    return %c0_i32, %c0_i32_0 : i32, i32
  }
  func.func @transform_2(%arg0: i32, %arg1: i32) -> (i32, i32) {
    %c0_i32 = arith.constant 0 : i32
    %c0_i32_0 = arith.constant 0 : i32
    %c0_i32_1 = arith.constant 0 : i32
    return %c0_i32, %c0_i32_0 : i32, i32
  }
  func.func @transform_3(%arg0: i32, %arg1: i32) -> (i32, i32, i32) {
    %c0_i32 = arith.constant 0 : i32
    %c0_i32_0 = arith.constant 0 : i32
    %c0_i32_1 = arith.constant 0 : i32
    %c0_i32_2 = arith.constant 0 : i32
    return %c0_i32, %c0_i32_0, %c0_i32_1 : i32, i32, i32
  }
  func.func @transform_4(%arg0: i32, %arg1: i32) -> (i32, i32) {
    %c0_i32 = arith.constant 0 : i32
    %c0_i32_0 = arith.constant 0 : i32
    %c0_i32_1 = arith.constant 0 : i32
    return %c0_i32, %c0_i32_0 : i32, i32
  }
  func.func @transform_5(%arg0: i32, %arg1: i32) -> (i32, i32) {
    %c0_i32 = arith.constant 0 : i32
    %c0_i32_0 = arith.constant 0 : i32
    %c0_i32_1 = arith.constant 0 : i32
    return %c0_i32, %c0_i32_0 : i32, i32
  }
  func.func @transform_6(%arg0: i32, %arg1: i32) -> (i32, i32) {
    %c0_i32 = arith.constant 0 : i32
    %c0_i32_0 = arith.constant 0 : i32
    %c0_i32_1 = arith.constant 0 : i32
    return %c0_i32, %c0_i32_0 : i32, i32
  }
  func.func @transform_7(%arg0: i32, %arg1: i32) -> (i32, i32, i32, i32) {
    %c0_i32 = arith.constant 0 : i32
    %c0_i32_0 = arith.constant 0 : i32
    %c0_i32_1 = arith.constant 0 : i32
    return %arg0, %arg1, %c0_i32, %c0_i32_0 : i32, i32, i32, i32
  }
}

</mosaic_0001>

<bundles_post_ra>
// kernel: tpu_custom_call.1
= control target key start
LH: loop header
LB: loop body
LE: loop exit
PB: predicated region body
PF: predicated region fallthrough
CT: control target
= control target key end

     0   :  { %12 = vsyncpa [#allocation3], 0  ;;  %s2653_s0 = inlined_call_operand.hbm [shape: f32[2,4,6,16,128], index: 0, kind: input, shape index: {}]   ;;  %s2654_s1 = inlined_call_operand.vmem [shape: bf16[128,32], index: 1, kind: input, shape index: {}]   ;;  %s2655_s2 = inlined_call_operand.vmem [shape: f32[1,32], index: 2, kind: input, shape index: {}]   ;;  %s2656_s3 = inlined_call_operand.vmem [shape: bf16[3,96,32], index: 3, kind: input, shape index: {}]   ;;  %s2657_s4 = inlined_call_operand.vmem [shape: f32[1,32], index: 4, kind: input, shape index: {}]   ;;  %s2658_s5 = inlined_call_operand.vmem [shape: bf16[32,128], index: 5, kind: input, shape index: {}]   ;;  %s2659_s6 = inlined_call_operand.vmem [shape: f32[1,128], index: 6, kind: input, shape index: {}]   ;;  %s2660_s7 = inlined_call_operand.hbm [shape: f32[2,16,16,128], index: 7, kind: output, shape index: {}]  }
   0x1   :  { %14 = vsyncpa [#allocation3 + $0x1], 0 }
   0x2   :  { %15 = vsyncpa [#allocation4], 0 }
   0x3   :  { %17 = vsyncpa [#allocation4 + $0x1], 0  ;;  %s2009_s24 = smov 0   ;;  %s2011_s25 = smov 0  }
   0x4   :  { %s2013_s26 = smov 0   ;;  %s2015_s27 = smov 0  }
   0x5   :  { %s2017_s28 = smov 0   ;;  %s2019_s29 = smov 0  }
   0x6   :  { %s2021_s30 = smov 0   ;;  %s2023_s8 = smov 0  }
   0x7 LB: > { %2667 = sst [smem:[#allocation8_spill]] %s1931_s24  ;;  %s1377_s9 = sadd.s32 4294967295, %s1959_s8   ;;  %s1959_s8 = sphi %s2023_s8, %s23_s8   ;;  %s1955_s30 = sphi %s2021_s30, %s2700_s30   ;;  %s1951_s29 = sphi %s2019_s29, %s2694_s29   ;;  %s1947_s28 = sphi %s2017_s28, %s2699_s28   ;;  %s1943_s27 = sphi %s2015_s27, %s2693_s27   ;;  %s1939_s26 = sphi %s2013_s26, %s2698_s26   ;;  %s1935_s25 = sphi %s2011_s25, %s2697_s25   ;;  %s1931_s24 = sphi %s2009_s24, %s2696_s24  }
   0x8   : > { %2668 = sst [smem:[#allocation9_spill]] %s1951_s29  ;;  %s1378_s10 = sadd.s32 4294967294, %s1959_s8  }
   0x9   : > { %s32_s11 = sadd.s32 1, %s1951_s29  ;;  %s35_s12 = sadd.s32 1, %s1955_s30 }
   0xa   : > { %p33_p0 = scmp.ge.s32.totalorder %s32_s11, 4  ;;  %s44_s13 = sadd.s32 1, %s1939_s26 }
   0xb   : > { %p51_p1 = scmp.ne.s32.totalorder %s1939_s26, %s1935_s25  ;;  %p52_p2 = scmp.eq.s32.totalorder %s1959_s8, 0 }
   0xc   : > { %s2702_s11 = smov (%p33_p0, %s32_s11), 0  ;;  %s2704_s12 = smov (!%p33_p0, %s35_s12), %s1955_s30 }
   0xd   : > { %2669 = sst [smem:[#allocation10_spill]] %s2702_s11  ;;  %s40_s14 = ssub.s32 %s1951_s29, %s2702_s11 }
   0xe   : > { %p2062_p3 = por %p52_p2, %p51_p1  ;;  %p37_p4 = scmp.ge.s32.totalorder %s2704_s12, 2 }
   0xf   : > { %p57_p5 = scmp.ne.s32.totalorder %s1935_s25, %s1931_s24  ;;  %p58_p6 = scmp.eq.s32.totalorder %s1377_s9, 0 }
  0x10   : > { %p209_p7 = scmp.eq.s32.totalorder %s1377_s9, 7  ;;  %s2706_s12 = smov (%p37_p4, %s2704_s12), 0 }
  0x11   : > { %2671 = sst [smem:[#allocation11_spill]] %s2706_s12  ;;  %p2070_p8 = por %p58_p6, %p57_p5 }
  0x12   : > { %p2074_p9 = por %p209_p7, %p51_p1  ;;  %s39_s18 = ssub.s32 %s1955_s30, %s2706_s12 }
  0x13   : > { %p215_p10 = scmp.eq.s32.totalorder %s1378_s10, 7  ;;  %s41_s19 = sor.u32 %s40_s14, %s39_s18 }
  0x14   : > { %s2673_s17 = scalar_select %p2074_p9, 1, 0 }
  0x15   : > { %p42_p11 = scmp.eq.s32.totalorder %s41_s19, 0  ;;  %p2080_p12 = por %p215_p10, %p57_p5 }
  0x16   : > { %p1671_p13 = scmp.lt.s32.totalorder %s1959_s8, 8  ;;  %s253_s21 = sand.u32 1, %s1939_s26  }
  0x17   : > { %s2674_s20 = scalar_select %p2080_p12, 1, 0 }
  0x18   : > { %s2087_s22 = scalar_select %p42_p11, %s1939_s26, %s44_s13  }
  0x19   : > { %2675 = sst [smem:[#allocation12_spill]] %s2674_s20  ;;  %s1655_s23 = smul.u32 96, %s253_s21 }
  0x1a   : > { %s1656_s9 = smul.u32 12, %s1951_s29  ;;  %p2092_p0 = pnand %p1671_p13, %p2062_p3 }
  0x1b   : > { %s1657_s10 = smul.u32 48, %s1955_s30  ;;  %s257_s14 = scalar_lea.vmem [#allocation2], %s1655_s23 }
  0x1c   : > { %s266_s18 = sshll.u32 %s257_s14, 4  ;;  %s2104_s15 = scalar_lea.sflag [#allocation3], %s253_s21  ;;  %s2097_s18 = int_to_ptr.vmem [resolvable:$true] %s266_s18 }
  0x1d   : > { %s263_s19 = sadd.s32 %s1657_s10, %s1656_s9  ;;  %p1833_p2 = pneg %p2092_p0 }
  0x1e   : > { %s1381_s12 = sshll.u32 %s263_s19, 7  ;;  %s1836_s24 = scalar_lea.hbm %s2653_s0, 12288 }
  0x1f   : > { %s2102_s13 = scalar_lea.hbm %s2653_s0, %s1381_s12 }
  0x20   : > { %s1831_s29 = scalar_lea.hbm %s2102_s13, 1536  ;;  %p1837_p5 = scmp.lt.u32.totalorder %s2102_s13, %s2653_s0 }
  0x21   : > { %p1832_p1 = scmp.ne.s32.totalorder %s2102_s13, %s1831_s29  ;;  %p1838_p6 = scmp.lt.u32.totalorder %s1836_s24, %s1831_s29 }
  0x22   : > { %p1840_p10 = scmp.lt.u32.totalorder %s1831_s29, %s2102_s13 }
  0x23   : > { %p1834_p3 = pnand %p1833_p2, %p1832_p1  ;;  %p1839_p7 = por %p1838_p6, %p1837_p5 }
  0x25   : > { %p1835_p4 = pneg %p1834_p3  ;;  %p1841_p11 = por %p1840_p10, %p1839_p7 }
  0x27   : > { %p1842_p13 = pnand %p1841_p11, %p1835_p4 }
  0x29   : > { %1845 = shalt.err (!%p1842_p13)
}
  0x2a   : > { %s1846_s21 = scalar_lea.vmem %s2097_s18, 1536  ;;  %s1961_s10 = smov [#allocation2]  }
  0x2b   : > { %p1847_p1 = scmp.ne.s32.totalorder %s2097_s18, %s1846_s21  ;;  %s1851_s14 = sshll.u32 %s1961_s10, 4  ;;  %s1852_s14 = int_to_ptr.vmem [resolvable:$false] %s1851_s14 }
  0x2c   : > { %s1853_s19 = scalar_lea.vmem %s1852_s14, 3072  ;;  %p1854_p9 = scmp.lt.s32.totalorder %s2097_s18, %s1852_s14 }
  0x2d   : > { %p1849_p3 = pnand %p1847_p1, %p1833_p2  ;;  %p1855_p5 = scmp.lt.s32.totalorder %s1853_s19, %s1846_s21 }
  0x2f   : > { %p1850_p12 = pneg %p1849_p3  ;;  %p1856_p6 = por %p1855_p5, %p1854_p9 }
  0x31   : > { %p1857_p7 = pnand %p1856_p6, %p1850_p12 }
  0x33   : > { %1860 = shalt.err (!%p1857_p7)
}
  0x34   : > { %s1962_s29 = smov 128   ;;  %s1963_s23 = smov 8  }
  0x35   : > { %1666 = dma.hbm_to_vmem [thread:$0]  (!%p2092_p0), %s2102_s13, 1536, %s2097_s18, %s2104_s15, %s1962_s29, %s1962_s29, %s1963_s23  }
  0x36   : > { %p1382_p2 = scmp.ge.s32.totalorder %s1959_s8, 1  ;;  %p274_p4 = scmp.lt.s32.totalorder %s1959_s8, 9 }
  0x38   : > { %p275_p10 = pnand %p1382_p2, %p274_p4 }
  0x39   : > { %s2135_s9 = sand.u32 (!%p275_p10), 1, %s1935_s25  }
  0x3a   : > { %278 = sbr.rel (%p275_p10) target bundleno = 958 (0x3be), region = 48  ;;  %s281_s12 = scalar_lea.sflag (!%p275_p10), [#allocation3], %s2135_s9 }
  0x3b   : > { %s1658_s24 = smul.u32 (!%p275_p10), 96, %s2135_s9 }
  0x3d   : > { %s2139_s20 = scalar_lea.vmem (!%p275_p10), [#allocation2], %s1658_s24 }
  0x41   : > { %1922 = dma.done.wait (%p2070_p8), %s281_s12, 1536  }
  0x42   : > { %1924 = vsyncadd (%p2070_p8), %s281_s12, 4294965760  ;;  %v1803_v0 = vld [vmem:[%s2654_s1] sm:$0xff]   ;;  %v1804_v1 = vld [vmem:[%s2654_s1 + $0x8] sm:$0xff]   ;;  %vm564_vm6 = vcmask 1040384   ;;  %vm601_vm7 = vcmask 1046528   ;;  %s1964_s29 = smov 32  }
  0x43   : > { %1527 = vmatprep.subr.bf16.mxu0 %v1803_v0  ;;  %v1805_v2 = vld [vmem:[%s2654_s1 + $0x10] sm:$0xff]   ;;  %v1806_v3 = vld [vmem:[%s2654_s1 + $0x18] sm:$0xff]   ;;  %v317_v4 = vld [vmem:[%s2139_s20] sm:$0xff]  ;;  %s1965_s12 = smov 64   ;;  %s1476_s24 = sshll.u32 %s1943_s27, 3 }
  0x44   : > { %1528 = vmatpush3.bf16.msra.mxu0 %v1803_v0  ;;  %v318_v5 = vld [vmem:[%s2139_s20 + $0x8] sm:$0xff]  ;;  %v1807_v7 = vld [vmem:[%s2654_s1 + $0x20] sm:$0xff]   ;;  %v1809_v9 = vld [vmem:[%s2654_s1 + $0x30] sm:$0xff]   ;;  %s1271_s21 = scalar_lea.sflag [#allocation4], %s2135_s9  ;;  %p2689_p9 = scmp.ne.s32.totalorder %s2673_s17, 0 }
  0x45   : > { %1529 = vmatprep.subr.bf16.mxu0 %v1804_v1  ;;  %v329_v6 = vpack.c.bf16 %v318_v5, %v317_v4  ;;  %v1808_v8 = vld [vmem:[%s2654_s1 + $0x28] sm:$0xff]   ;;  %v1810_v10 = vld [vmem:[%s2654_s1 + $0x38] sm:$0xff]   ;;  %v2172_v11 = vld [vmem:[%s2139_s20 + $0x10] sm:$0xff]  ;;  %s1966_s16 = smov [#allocation5]  }
  0x46   : > { %v2175_v12 = vld [vmem:[%s2139_s20 + $0x18] sm:$0xff]  ;;  %v2178_v13 = vld [vmem:[%s2139_s20 + $0x20] sm:$0xff]  ;;  %v2181_v14 = vld [vmem:[%s2139_s20 + $0x28] sm:$0xff]  ;;  %s1865_s14 = sshll.u32 %s1966_s16, 4  ;;  %s1866_s14 = int_to_ptr.vmem [resolvable:$false] %s1865_s14 }
  0x47   : > { %1543 = vmatprep.mubr.bf16.mxu0 %v329_v6  ;;  %v330_v15 = vpack.c.bf16 %v2175_v12, %v2172_v11  ;;  %v331_v16 = vpack.c.bf16 %v2181_v14, %v2178_v13  ;;  %v2188_v17 = vld [vmem:[%s2139_s20 + $0x30] sm:$0xff]  ;;  %v2191_v18 = vld [vmem:[%s2139_s20 + $0x38] sm:$0xff]  ;;  %v2194_v19 = vld [vmem:[%s2139_s20 + $0x40] sm:$0xff]  ;;  %s1867_s19 = scalar_lea.vmem %s1866_s14, 2048 }
  0x48   : > { %1530 = vmatpush3.bf16.msra.mxu0 %v1804_v1  ;;  %v2197_v20 = vld [vmem:[%s2139_s20 + $0x48] sm:$0xff]  ;;  %v332_v21 = vpack.c.bf16 %v2191_v18, %v2188_v17  ;;  %v327_v23 = vld [vmem:[%s2139_s20 + $0x50] sm:$0xff]  ;;  %v328_v24 = vld [vmem:[%s2139_s20 + $0x58] sm:$0xff]  ;;  %s1393_s20 = sshll.u32 %s1943_s27, 2 }
  0x49   : > { %1531 = vmatprep.subr.bf16.mxu0 %v1805_v2  ;;  %v333_v22 = vpack.c.bf16 %v2197_v20, %v2194_v19  ;;  %v334_v25 = vpack.c.bf16 %v328_v24, %v327_v23  ;;  %v1811_v26 = vld [vmem:[%s2656_s3 + $0x30] sm:$0xff]   ;;  %v1812_v27 = vld [vmem:[%s2656_s3 + $0x38] sm:$0xff]   ;;  %v2214_v28 = vld [vmem:[%s2656_s3 + $0x60] sm:$0xff]   ;;  %v500_v29 = vstv %s1393_s20 }
  0x4a   : > { %1555 = vmatprep.subr.bf16.mxu1 %v1811_v26  ;;  %v1394_v30 = vadd.s32 4294967295, %v500_v29  ;;  %v502_v31 = vadd.s32 3, %v500_v29  ;;  %v1814_v32 = vld [vmem:[%s2656_s3 + $0x40] sm:$0xff]   ;;  %v2225_v33 = vld [vmem:[%s2656_s3 + $0x68] sm:$0xff]   ;;  %v501_v35 = vadd.s32 2, %v500_v29  ;;  %vm511_vm0 = vcmp.ge.s32.totalorder %v500_v29, 0 }
  0x4b   : > { %1556 = vmatpush3.bf16.msra.mxu1 %v1811_v26  ;;  %v2230_v34 = vld [vmem:[%s2655_s2] ss:$0 sm:$0xff]  ;;  %vm517_vm1 = vcmp.lt.s32.totalorder %v500_v29, 16  ;;  %v503_v37 = vadd.s32 4, %v500_v29  ;;  %v1816_v38 = vld [vmem:[%s2656_s3 + $0x48] sm:$0xff]   ;;  %v2240_v39 = vld [vmem:[%s2656_s3 + $0x70] sm:$0xff]  }
  0x4c   : > { %1532 = vmatpush3.bf16.msra.mxu0 %v1805_v2  ;;  %1557 = vmatprep.subr.bf16.mxu1 %v1812_v27  ;;  %vm510_vm2 = vcmp.ge.s32.totalorder %v1394_v30, 0  ;;  %vm516_vm3 = vcmp.lt.s32.totalorder %v1394_v30, 16  ;;  %v1396_v42 = vadd.s32 4294967295, %v502_v31  ;;  %v1818_v43 = vld [vmem:[%s2656_s3 + $0x50] sm:$0xff]   ;;  %vm2248_vm4 = vmand %vm511_vm0, %vm517_vm1  ;;  %v1395_v47 = vadd.s32 4294967295, %v501_v35  ;;  %v2342_v44 = vld [vmem:[%s2656_s3 + $0x80] sm:$0xff]  }
  0x4d   : > { %1533 = vmatprep.subr.bf16.mxu0 %v1806_v3  ;;  %vm2256_vm5 = vmand %vm510_vm2, %vm516_vm3  ;;  %v504_v52 = vadd.s32 5, %v500_v29  ;;  %v2262_v55 = vadd.s32 4294967295, %v503_v37 }
  0x4e   : > { %vm513_vm8 = vcmp.ge.s32.totalorder %v1396_v42, 0  ;;  %vm519_vm9 = vcmp.lt.s32.totalorder %v1396_v42, 16  ;;  %vm512_vm10 = vcmp.ge.s32.totalorder %v1395_v47, 0  ;;  %vm518_vm11 = vcmp.lt.s32.totalorder %v1395_v47, 16 }
  0x4f   : > { %1558 = vmatpush3.bf16.msra.mxu1 %v1812_v27  ;;  %v2277_v63 = vadd.s32 4294967295, %v504_v52  ;;  %vm514_vm12 = vcmp.ge.s32.totalorder %v2262_v55, 0  ;;  %vm520_vm13 = vcmp.lt.s32.totalorder %v2262_v55, 16  ;;  %vm2297_vm14 = vmand %vm513_vm8, %vm519_vm9 }
  0x50   : > { %1534 = vmatpush3.bf16.msra.mxu0 %v1806_v3  ;;  %1559 = vmatprep.subr.bf16.mxu1 %v1814_v32  ;;  %vm2309_vm15 = vmand %vm512_vm10, %vm518_vm11 }
  0x51   : > { %1535 = vmatprep.subr.bf16.mxu0 %v1807_v7  ;;  %vm515_vm0 = vcmp.ge.s32.totalorder %v2277_v63, 0  ;;  %vm521_vm1 = vcmp.lt.s32.totalorder %v2277_v63, 16  ;;  %vm2393_vm3 = vmand %vm514_vm12, %vm520_vm13 }
  0x52   : > { %vm2376_vm2 = vmand %vm515_vm0, %vm521_vm1 }
  0x53   : > { %1560 = vmatpush3.bf16.msra.mxu1 %v1814_v32 }
  0x54   : > { %1536 = vmatpush3.bf16.msra.mxu0 %v1807_v7  ;;  %1561 = vmatprep.subr.bf16.mxu1 %v1816_v38 }
  0x55   : > { %1537 = vmatprep.subr.bf16.mxu0 %v1808_v8 }
  0x57   : > { %1562 = vmatpush3.bf16.msra.mxu1 %v1816_v38  ;;  %v1820_v38 = vld [vmem:[%s2656_s3 + $0x58] sm:$0xff]  }
  0x58   : > { %1538 = vmatpush3.bf16.msra.mxu0 %v1808_v8  ;;  %1563 = vmatprep.subr.bf16.mxu1 %v1818_v43 }
  0x59   : > { %1539 = vmatprep.subr.bf16.mxu0 %v1809_v9 }
  0x5b   : > { %1564 = vmatpush3.bf16.msra.mxu1 %v1818_v43 }
  0x5c   : > { %1540 = vmatpush3.bf16.msra.mxu0 %v1809_v9  ;;  %1565 = vmatprep.subr.bf16.mxu1 %v1820_v38 }
  0x5d   : > { %1541 = vmatprep.subr.bf16.mxu0 %v1810_v10 }
  0x5f   : > { %1566 = vmatpush3.bf16.msra.mxu1 %v1820_v38 }
  0x60   : > { %1542 = vmatpush3.bf16.msra.mxu0 %v1810_v10  ;;  %v2293_v10 = vld [vmem:[%s2656_s3 + $0x78] sm:$0xff]  }
  0x61   : > { %1595 = vmatprep.subr.bf16.mxu0 %v2214_v28 }
  0x63   : > { %1544 = vmatmul.mubr.bf16.vlgmr.msra.gmra.mrb[0].mxu0 %v330_v15  ;;  %v2387_v15 = vld [vmem:[%s2656_s3 + $0x88] sm:$0xff]  }
  0x64   : > { %1547 = vmatprep.mubr.bf16.mxu0 %v331_v16  ;;  %1596 = vmatpush3.bf16.msra.mxu0 %v2214_v28 }
  0x65   : > { %1597 = vmatprep.subr.bf16.mxu0 %v2225_v33 }
  0x68   : > { %1598 = vmatpush3.bf16.msra.mxu0 %v2225_v33 }
  0x69   : > { %1599 = vmatprep.subr.bf16.mxu0 %v2240_v39 }
  0x6b   : > { %1548 = vmatmul.mubr.bf16.gmra.mrb[4].mxu0 %v332_v21 }
  0x6c   : > { %1551 = vmatprep.mubr.bf16.mxu0 %v333_v22  ;;  %1600 = vmatpush3.bf16.msra.mxu0 %v2240_v39 }
  0x6d   : > { %1601 = vmatprep.subr.bf16.mxu0 %v2293_v10 }
  0x70   : > { %1602 = vmatpush3.bf16.msra.mxu0 %v2293_v10 }
  0x71   : > { %1603 = vmatprep.subr.bf16.mxu0 %v2342_v44 }
  0x73   : > { %1552 = vmatmul.mubr.bf16.gmra.mrb[8].mxu0 %v334_v25 }
  0x74   : > { %1604 = vmatpush3.bf16.msra.mxu0 %v2342_v44 }
  0x75   : > { %1605 = vmatprep.subr.bf16.mxu0 %v2387_v15 }
  0x78   : > { %1606 = vmatpush3.bf16.msra.mxu0 %v2387_v15 }
 0x136   : > { %v1545_v36 = vpop.f32.mrb[0].mxu0 }
 0x137   : > { %v449_v40 = vadd.f32 %v1545_v36, %v2230_v34  ;;  %v440_v41 = vpop.f32.mrb[1].mxu0 }
 0x138   : > { %v441_v45 = vadd.f32 %v2230_v34, %v440_v41  ;;  %v1546_v46 = vpop.f32.mrb[2].mxu0 }
 0x139   : > { %v489_v48 = vmax.f32 %v449_v40, 0.0  ;;  %v452_v50 = vadd.f32 %v1546_v46, %v2230_v34  ;;  %v443_v51 = vpop.f32.mrb[3].mxu0 }
 0x13a   : > { %v487_v53 = vmax.f32 %v441_v45, 0.0  ;;  %v444_v54 = vadd.f32 %v2230_v34, %v443_v51  ;;  %v2347_v45 = vld [vmem:[%s2656_s3] sm:$0xff]  }
 0x13b   : > { %v2267_v56 = vsel %vm2248_vm4, %v489_v48, 0.0  ;;  %v490_v57 = vmax.f32 %v452_v50, 0.0  ;;  %1575 = vmatprep.subr.bf16.mxu1 %v2347_v45 }
 0x13c   : > { %v2271_v58 = vsel %vm2256_vm5, %v487_v53, 0.0  ;;  %v488_v59 = vmax.f32 %v444_v54, 0.0  ;;  %v568_v60 = vrot.slane %v2267_v56, 7  ;;  %v605_v61 = vrot.slane %v2267_v56, 1 }
 0x13d   : > { %v543_v62 = vsel %vm2248_vm4, %v490_v57, 0.0  ;;  %v602_v5 = vrot.slane %v2271_v58, 1  ;;  %v565_v40 = vrot.slane %v2271_v58, 7  ;;  %vm710_vm4 = vcmask 261120  }
 0x13e   : > { %v569_v0 = vrot.slane %v543_v62, 7  ;;  %v2281_v1 = vsel %vm2256_vm5, %v488_v59, 0.0  ;;  %v1549_v2 = vpop.f32.mrb[4].mxu0  ;;  %v1743_v3 = vpack.i.bf16 %v543_v62, %v2267_v56  ;;  %v606_v4 = vrot.slane %v543_v62, 1 }
 0x13f   : > { %v566_v6 = vrot.slane %v2281_v1, 7  ;;  %v603_v7 = vrot.slane %v2281_v1, 1  ;;  %v465_v8 = vadd.f32 %v1549_v2, %v2230_v34  ;;  %v456_v9 = vpop.f32.mrb[5].mxu0  ;;  %v1783_v24 = vpack.i.bf16 %v2281_v1, %v2271_v58  ;;  %v1827_v58 = vld [vmem:[%s2656_s3 + $0x20] sm:$0xff]  }
 0x140   : > { %v457_v16 = vadd.f32 %v2230_v34, %v456_v9  ;;  %1744 = vrot.lane.b32.xlu0 %v1743_v3, %s1964_s29  ;;  %v1550_v21 = vpop.f32.mrb[6].mxu0  ;;  %v607_v22 = vsel %vm601_vm7, %v605_v61, %v606_v4  ;;  %v627_v23 = vsel %vm601_vm7, %v606_v4, 0.0  ;;  %v2325_v37 = vsel %vm564_vm6, %v568_v60, %v569_v0 }
 0x141   : > { %v493_v25 = vmax.f32 %v465_v8, 0.0  ;;  %v468_v27 = vadd.f32 %v1550_v21, %v2230_v34  ;;  %v459_v29 = vpop.f32.mrb[7].mxu0  ;;  %v1753_v30 = vpack.i.bf16 %v627_v23, %v607_v22  ;;  %v2315_v31 = vsel %vm601_vm7, %v602_v5, %v603_v7 }
 0x142   : > { %v491_v32 = vmax.f32 %v457_v16, 0.0  ;;  %v460_v35 = vadd.f32 %v2230_v34, %v459_v29  ;;  %v2320_v36 = vsel %vm601_vm7, %v603_v7, 0.0  ;;  %v2363_v51 = vsel %vm564_vm6, %v565_v40, %v566_v6 }
 0x143   : > { %v2334_v41 = vsel %vm2297_vm14, %v493_v25, 0.0  ;;  %v494_v42 = vmax.f32 %v468_v27, 0.0  ;;  %1754 = vrot.lane.b32.xlu1 %v1753_v30, %s1965_s12  ;;  %v1788_v43 = vpack.i.bf16 %v2320_v36, %v2315_v31  ;;  %vm723_vm5 = vcmask 523264  }
 0x144   : > { %v2351_v46 = vsel %vm2309_vm15, %v491_v32, 0.0  ;;  %v492_v47 = vmax.f32 %v460_v35, 0.0  ;;  %v574_v48 = vrot.slane %v2334_v41, 7  ;;  %v611_v49 = vrot.slane %v2334_v41, 1 }
 0x145   : > { %v547_v50 = vsel %vm2297_vm14, %v494_v42, 0.0  ;;  %v571_v52 = vrot.slane %v2351_v46, 7  ;;  %v608_v53 = vrot.slane %v2351_v46, 1  ;;  %v596_v1 = vsel %vm564_vm6, 0.0, %v568_v60 }
 0x146   : > { %v612_v54 = vrot.slane %v547_v50, 1  ;;  %v545_v57 = vsel %vm2309_vm15, %v492_v47, 0.0  ;;  %v1553_v59 = vpop.f32.mrb[8].mxu0  ;;  %v575_v61 = vrot.slane %v547_v50, 7  ;;  %v1763_v8 = vpack.i.bf16 %v547_v50, %v2334_v41 }
 0x147   : > { %v572_v62 = vrot.slane %v545_v57, 7  ;;  %v609_v0 = vrot.slane %v545_v57, 1  ;;  %v481_v2 = vadd.f32 %v1553_v59, %v2230_v34  ;;  %v472_v3 = vpop.f32.mrb[9].mxu0  ;;  %v1748_v7 = vpack.i.bf16 %v545_v57, %v2351_v46  ;;  %v1824_v46 = vld [vmem:[%s2656_s3 + $0x8] sm:$0xff]  }
 0x148   : > { %v473_v5 = vadd.f32 %v2230_v34, %v472_v3  ;;  %v1554_v6 = vpop.f32.mrb[10].mxu0  ;;  %v613_v9 = vsel %vm601_vm7, %v611_v49, %v612_v54  ;;  %v629_v30 = vsel %vm601_vm7, %v612_v54, 0.0  ;;  %v2426_v57 = vsel %vm564_vm6, %v574_v48, %v575_v61 }
 0x149   : > { %v497_v16 = vmax.f32 %v481_v2, 0.0  ;;  %v484_v21 = vadd.f32 %v1554_v6, %v2230_v34  ;;  %v475_v22 = vpop.f32.mrb[11].mxu0  ;;  %v610_v23 = vsel %vm601_vm7, %v608_v53, %v609_v0  ;;  %v628_v25 = vsel %vm601_vm7, %v609_v0, 0.0  ;;  %1749 = vrot.lane.b32.xlu0 %v1748_v7, %s1964_s29 }
 0x14a   : > { %v495_v26 = vmax.f32 %v473_v5, 0.0  ;;  %v476_v27 = vadd.f32 %v2230_v34, %v475_v22  ;;  %v1758_v29 = vpack.i.bf16 %v628_v25, %v610_v23  ;;  %v1768_v35 = vpack.i.bf16 %v629_v30, %v613_v9 }
 0x14b   : > { %v2406_v55 = vsel %vm2376_vm2, %v497_v16, 0.0  ;;  %v498_v32 = vmax.f32 %v484_v21, 0.0  ;;  %v573_v38 = vsel %vm564_vm6, %v571_v52, %v572_v62  ;;  %v597_v60 = vsel %vm564_vm6, 0.0, %v571_v52 }
 0x14c   : > { %v580_v34 = vrot.slane %v2406_v55, 7  ;;  %v617_v42 = vrot.slane %v2406_v55, 1  ;;  %v2416_v47 = vsel %vm2393_vm3, %v495_v26, 0.0  ;;  %v496_v49 = vmax.f32 %v476_v27, 0.0  ;;  %1759 = vrot.lane.b32.xlu1 %v1758_v29, %s1965_s12 }
 0x14d   : > { %v577_v50 = vrot.slane %v2416_v47, 7  ;;  %v614_v53 = vrot.slane %v2416_v47, 1  ;;  %v551_v54 = vsel %vm2376_vm2, %v498_v32, 0.0  ;;  %1764 = vrot.lane.b32.xlu0 %v1763_v8, %s1964_s29 }
 0x14e   : > { %v581_v59 = vrot.slane %v551_v54, 7  ;;  %v618_v62 = vrot.slane %v551_v54, 1  ;;  %v549_v0 = vsel %vm2393_vm3, %v496_v49, 0.0  ;;  %v1793_v2 = vpack.i.bf16 %v551_v54, %v2406_v55  ;;  %v1828_v55 = vld [vmem:[%s2656_s3 + $0x28] sm:$0xff]  }
 0x14f   : > { %v578_v3 = vrot.slane %v549_v0, 7  ;;  %v615_v5 = vrot.slane %v549_v0, 1  ;;  %v1773_v6 = vpack.i.bf16 %v549_v0, %v2416_v47  ;;  %v1826_v47 = vld [vmem:[%s2656_s3 + $0x18] sm:$0xff]  }
 0x150   : > { %v619_v4 = vsel %vm601_vm7, %v617_v42, %v618_v62  ;;  %v631_v7 = vsel %vm601_vm7, %v618_v62, 0.0  ;;  %v2438_v61 = vsel %vm564_vm6, %v580_v34, %v581_v59 }
 0x151   : > { %1774 = vrot.lane.b32.xlu1 %v1773_v6, %s1964_s29  ;;  %v616_v9 = vsel %vm601_vm7, %v614_v53, %v615_v5  ;;  %v630_v8 = vsel %vm601_vm7, %v615_v5, 0.0  ;;  %v1798_v16 = vpack.i.bf16 %v631_v7, %v619_v4  ;;  %v2446_v63 = vsel %vm564_vm6, %v577_v50, %v578_v3  ;;  %1769 = vrot.lane.b32.xlu0 %v1768_v35, %s1965_s12 }
 0x152   : > { %v1778_v21 = vpack.i.bf16 %v630_v8, %v616_v9  ;;  %vm803_vm7 = vcmask 785408   ;;  %v598_v6 = vsel %vm564_vm6, 0.0, %v574_v48 }
 0x155   : > { %1779 = vrot.lane.b32.xlu1 %v1778_v21, %s1965_s12  ;;  %1784 = vrot.lane.b32.xlu0 %v1783_v24, %s1964_s29 }
 0x159   : > { %1789 = vrot.lane.b32.xlu1 %v1788_v43, %s1965_s12  ;;  %1794 = vrot.lane.b32.xlu0 %v1793_v2, %s1964_s29  ;;  %s1383_s29 = sshll.u32 %s2135_s9, 6 }
 0x15a   : > { %s2577_s23 = scalar_lea.vmem [#allocation5], %s1383_s29 }
 0x15b   : > { %s1287_s18 = sshll.u32 %s2577_s23, 4  ;;  %s2589_s18 = int_to_ptr.vmem [resolvable:$true] %s1287_s18 }
 0x15c   : > { %s1861_s10 = scalar_lea.vmem %s2589_s18, 1024  ;;  %p1868_p11 = scmp.lt.s32.totalorder %s2589_s18, %s1866_s14 }
 0x15d   : > { %1799 = vrot.lane.b32.xlu1 %v1798_v16, %s1965_s12  ;;  %s1472_s12 = sshll.u32 %s1947_s28, 5  ;;  %p1862_p8 = scmp.ne.s32.totalorder %s2589_s18, %s1861_s10 }
 0x15e   : > { %s1284_s11 = sadd.s32 %s1476_s24, %s1472_s12  ;;  %p1869_p13 = scmp.lt.s32.totalorder %s1867_s19, %s1861_s10 }
 0x15f   : > { %s1473_s27 = sshll.u32 %s1284_s11, 7  ;;  %p1863_p12 = pnand %p1862_p8, %p2689_p9 }
 0x160   : > { %s2597_s15 = scalar_lea.hbm %s2660_s7, %s1473_s27  ;;  %p1870_p1 = por %p1869_p13, %p1868_p11 }
 0x161   : > { %p1864_p0 = pneg %p1863_p12 }
 0x163   : > { %p1871_p3 = pnand %p1870_p1, %p1864_p0 }
 0x1b2   : > { %v1745_v22 = vpop.permute.xlu0 %1744 }
 0x1b3   : > { %v1747_v23 = vunpack.i.h.bf16 %v1745_v22  ;;  %v1746_v25 = vunpack.i.l.bf16 %v1745_v22 }
 0x1b5   : > { %v1755_v26 = vpop.permute.xlu1 %1754  ;;  %v713_v24 = vsel %vm710_vm4, %v596_v1, %v1746_v25  ;;  %v714_v31 = vsel %vm710_vm4, %v2325_v37, %v1747_v23  ;;  %v1825_v23 = vld [vmem:[%s2656_s3 + $0x10] sm:$0xff]   ;;  %v599_v25 = vsel %vm564_vm6, 0.0, %v577_v50 }
 0x1b6   : > { %v1757_v27 = vunpack.i.h.bf16 %v1755_v26  ;;  %v1756_v29 = vunpack.i.l.bf16 %v1755_v26 }
 0x1b8   : > { %v726_v36 = vsel %vm723_vm5, %v713_v24, %v1756_v29  ;;  %v727_v43 = vsel %vm723_vm5, %v714_v31, %v1757_v27 }
 0x1b9   : > { %v2468_v30 = vpack.c.bf16 %v727_v43, %v726_v36 }
 0x1bb   : > { %1567 = vmatprep.mubr.msk.bf16.mxu1 %vm803_vm7, %v2468_v30  ;;  %v1750_v32 = vpop.permute.xlu0 %1749 }
 0x1bc   : > { %v1752_v35 = vunpack.i.h.bf16 %v1750_v32  ;;  %v1751_v56 = vunpack.i.l.bf16 %v1750_v32  ;;  %v595_v32 = vsel %vm564_vm6, 0.0, %v565_v40 }
 0x1be   : > { %v1760_v42 = vpop.permute.xlu1 %1759  ;;  %v715_v53 = vsel %vm710_vm4, %v597_v60, %v1751_v56  ;;  %v716_v54 = vsel %vm710_vm4, %v573_v38, %v1752_v35 }
 0x1bf   : > { %v1762_v49 = vunpack.i.h.bf16 %v1760_v42  ;;  %v1761_v37 = vunpack.i.l.bf16 %v1760_v42  ;;  %v1765_v59 = vpop.permute.xlu0 %1764 }
 0x1c0   : > { %v1767_v3 = vunpack.i.h.bf16 %v1765_v59  ;;  %v1766_v5 = vunpack.i.l.bf16 %v1765_v59 }
 0x1c1   : > { %v728_v62 = vsel %vm723_vm5, %v715_v53, %v1761_v37  ;;  %v729_v0 = vsel %vm723_vm5, %v716_v54, %v1762_v49 }
 0x1c2   : > { %v2479_v2 = vpack.c.bf16 %v729_v0, %v728_v62  ;;  %v718_v16 = vsel %vm710_vm4, %v2426_v57, %v1767_v3  ;;  %v717_v41 = vsel %vm710_vm4, %v598_v6, %v1766_v5 }
 0x1c3   : > { %v1775_v52 = vpop.permute.xlu1 %1774  ;;  %v1770_v4 = vpop.permute.xlu0 %1769 }
 0x1c4   : > { %1568 = vmatmul.mubr.msk.bf16.vlgmr.msra.gmra.mrb[0].mxu1 %vm803_vm7, %v2479_v2  ;;  %1607 = vmatprep.mubr.msk.bf16.mxu0 %vm803_vm7, %v2479_v2  ;;  %v1772_v38 = vunpack.i.h.bf16 %v1770_v4  ;;  %v1771_v7 = vunpack.i.l.bf16 %v1770_v4  ;;  %v1777_v9 = vunpack.i.h.bf16 %v1775_v52  ;;  %v1776_v8 = vunpack.i.l.bf16 %v1775_v52 }
 0x1c5   : > { %1576 = vmatpush3.bf16.msra.mxu1 %v2347_v45 }
 0x1c6   : > { %1577 = vmatprep.subr.bf16.mxu1 %v1824_v46  ;;  %v730_v48 = vsel %vm723_vm5, %v717_v41, %v1771_v7  ;;  %v731_v21 = vsel %vm723_vm5, %v718_v16, %v1772_v38  ;;  %v720_v29 = vsel %vm710_vm4, %v2446_v63, %v1777_v9  ;;  %v719_v1 = vsel %vm710_vm4, %v599_v25, %v1776_v8 }
 0x1c7   : > { %v1780_v22 = vpop.permute.xlu1 %1779  ;;  %v739_v45 = vpack.c.bf16 %v731_v21, %v730_v48  ;;  %v1785_v57 = vpop.permute.xlu0 %1784 }
 0x1c8   : > { %v1782_v26 = vunpack.i.h.bf16 %v1780_v22  ;;  %v1781_v27 = vunpack.i.l.bf16 %v1780_v22  ;;  %v1787_v24 = vunpack.i.h.bf16 %v1785_v57  ;;  %v1786_v31 = vunpack.i.l.bf16 %v1785_v57 }
 0x1c9   : > { %1578 = vmatpush3.bf16.msra.mxu1 %v1824_v46  ;;  %1571 = vmatprep.mubr.msk.bf16.mxu1 %vm803_vm7, %v739_v45 }
 0x1ca   : > { %v732_v36 = vsel %vm723_vm5, %v719_v1, %v1781_v27  ;;  %v733_v43 = vsel %vm723_vm5, %v720_v29, %v1782_v26  ;;  %1608 = vmatmul.mubr.msk.bf16.vlgmr.msra.gmra.mrb[12].mxu0 %vm803_vm7, %v739_v45  ;;  %1579 = vmatprep.subr.bf16.mxu1 %v1825_v23  ;;  %v711_v60 = vsel %vm710_vm4, %v595_v32, %v1786_v31 }
 0x1cb   : > { %v740_v50 = vpack.c.bf16 %v733_v43, %v732_v36  ;;  %v1790_v63 = vpop.permute.xlu1 %1789  ;;  %v1795_v35 = vpop.permute.xlu0 %1794  ;;  %v712_v49 = vsel %vm710_vm4, %v2363_v51, %v1787_v24  ;;  %v600_v51 = vsel %vm564_vm6, 0.0, %v580_v34 }
 0x1cc   : > { %v1792_v56 = vunpack.i.h.bf16 %v1790_v63  ;;  %v1791_v42 = vunpack.i.l.bf16 %v1790_v63  ;;  %v1797_v37 = vunpack.i.h.bf16 %v1795_v35  ;;  %v1796_v53 = vunpack.i.l.bf16 %v1795_v35 }
 0x1cd   : > { %1580 = vmatpush3.bf16.msra.mxu1 %v1825_v23 }
 0x1ce   : > { %v724_v54 = vsel %vm723_vm5, %v711_v60, %v1791_v42  ;;  %v725_v59 = vsel %vm723_vm5, %v712_v49, %v1792_v56  ;;  %1572 = vmatmul.mubr.msk.bf16.gmra.mrb[4].mxu1 %vm803_vm7, %v740_v50  ;;  %1581 = vmatprep.subr.bf16.mxu1 %v1826_v47  ;;  %v722_v5 = vsel %vm710_vm4, %v2438_v61, %v1797_v37  ;;  %v1454_v49 = vld [vmem:[%s2659_s6] ss:$0 sm:$0xff] }
 0x1cf   : > { %v736_v40 = vpack.c.bf16 %v725_v59, %v724_v54  ;;  %v1800_v62 = vpop.permute.xlu1 %1799  ;;  %v721_v46 = vsel %vm710_vm4, %v600_v51, %v1796_v53 }
 0x1d0   : > { %v1802_v0 = vunpack.i.h.bf16 %v1800_v62  ;;  %v1801_v3 = vunpack.i.l.bf16 %v1800_v62 }
 0x1d1   : > { %1582 = vmatpush3.bf16.msra.mxu1 %v1826_v47  ;;  %1587 = vmatprep.mubr.msk.bf16.mxu1 %vm803_vm7, %v736_v40 }
 0x1d2   : > { %v735_v52 = vsel %vm723_vm5, %v722_v5, %v1802_v0  ;;  %v734_v6 = vsel %vm723_vm5, %v721_v46, %v1801_v3  ;;  %1583 = vmatprep.subr.bf16.mxu1 %v1827_v58 }
 0x1d3   : > { %v741_v34 = vpack.c.bf16 %v735_v52, %v734_v6 }
 0x1d5   : > { %1584 = vmatpush3.bf16.msra.mxu1 %v1827_v58 }
 0x1d6   : > { %1585 = vmatprep.subr.bf16.mxu1 %v1828_v55 }
 0x1d9   : > { %1586 = vmatpush3.bf16.msra.mxu1 %v1828_v55 }
 0x1da   : > { %1627 = vmatprep.subr.bf16.mxu1 %v2214_v28 }
 0x1dc   : > { %1588 = vmatmul.mubr.msk.bf16.vlgmr.msra.gmra.mrb[0].mxu1 %vm803_vm7, %v2468_v30 }
 0x1dd   : > { %1591 = vmatprep.mubr.msk.bf16.mxu1 %vm803_vm7, %v2479_v2  ;;  %1633 = vmatpush3.bf16.msra.mxu1 %v2214_v28  ;;  %v1829_v28 = vld [vmem:[%s2658_s5] sm:$0xff]  }
 0x1de   : > { %1628 = vmatprep.subr.bf16.mxu1 %v2225_v33  ;;  %1615 = vmatprep.subr.bf16.mxu0 %v1829_v28 }
 0x1df   : > { %1616 = vmatpush3.bf16.msra.mxu0 %v1829_v28 }
 0x1e1   : > { %1634 = vmatpush3.bf16.msra.mxu1 %v2225_v33  ;;  %v1830_v33 = vld [vmem:[%s2658_s5 + $0x8] sm:$0xff]  }
 0x1e2   : > { %1629 = vmatprep.subr.bf16.mxu1 %v2240_v39  ;;  %1617 = vmatprep.subr.bf16.mxu0 %v1830_v33 }
 0x1e3   : > { %1618 = vmatpush3.bf16.msra.mxu0 %v1830_v33 }
 0x1e4   : > { %1592 = vmatmul.mubr.msk.bf16.gmra.mrb[4].mxu1 %vm803_vm7, %v739_v45 }
 0x1e5   : > { %1635 = vmatpush3.bf16.msra.mxu1 %v2240_v39  ;;  %1611 = vmatprep.mubr.msk.bf16.mxu1 %vm803_vm7, %v740_v50 }
 0x1e6   : > { %1630 = vmatprep.subr.bf16.mxu1 %v2293_v10 }
 0x1e9   : > { %1636 = vmatpush3.bf16.msra.mxu1 %v2293_v10 }
 0x1ea   : > { %1631 = vmatprep.subr.bf16.mxu1 %v2342_v44 }
 0x1ed   : > { %1637 = vmatpush3.bf16.msra.mxu1 %v2342_v44 }
 0x1ee   : > { %1632 = vmatprep.subr.bf16.mxu1 %v2387_v15 }
 0x1f1   : > { %1638 = vmatpush3.bf16.msra.mxu1 %v2387_v15  ;;  %v1453_v15 = vld [vmem:[%s2657_s4] ss:$0 sm:$0xff] }
 0x1f4   : > { %1612 = vmatmul.mubr.msk.bf16.vlgmr.msra.gmra.mrb[4].mxu1 %vm803_vm7, %v741_v34 }
 0x29d   : > { %v1609_v39 = vpop.f32.mrb[12].mxu0 }
 0x29e   : > { %v1071_v10 = vpop.f32.mrb[13].mxu0 }
 0x29f   : > { %v1610_v44 = vpop.f32.mrb[14].mxu0 }
 0x2a0   : > { %v1074_v61 = vpop.f32.mrb[15].mxu0 }
 0x2af   : > { %v1589_v30 = vpop.f32.mrb[0].mxu1 }
 0x2b0   : > { %v1639_v2 = vadd.f32 %v1609_v39, %v1589_v30  ;;  %v954_v4 = vpop.f32.mrb[1].mxu1 }
 0x2b1   : > { %v1640_v38 = vadd.f32 %v1071_v10, %v954_v4  ;;  %v1590_v7 = vpop.f32.mrb[2].mxu1 }
 0x2b2   : > { %v1119_v9 = vadd.f32 %v1639_v2, %v1453_v15  ;;  %v1641_v8 = vadd.f32 %v1610_v44, %v1590_v7  ;;  %v957_v16 = vpop.f32.mrb[3].mxu1 }
 0x2b3   : > { %v1117_v41 = vadd.f32 %v1640_v38, %v1453_v15  ;;  %v1642_v48 = vadd.f32 %v1074_v61, %v957_v16 }
 0x2b4   : > { %v1120_v21 = vadd.f32 %v1641_v8, %v1453_v15  ;;  %v1127_v23 = vmax.f32 %v1119_v9, 0.0 }
 0x2b5   : > { %v1118_v22 = vadd.f32 %v1642_v48, %v1453_v15  ;;  %v1125_v45 = vmax.f32 %v1117_v41, 0.0 }
 0x2b6   : > { %v1128_v25 = vmax.f32 %v1120_v21, 0.0 }
 0x2b7   : > { %v1126_v26 = vmax.f32 %v1118_v22, 0.0 }
 0x2b8   : > { %v1134_v27 = vpack.c.bf16 %v1128_v25, %v1127_v23 }
 0x2b9   : > { %v1133_v57 = vpack.c.bf16 %v1126_v26, %v1125_v45 }
 0x2bb   : > { %1619 = vmatprep.mubr.msk.bf16.mxu0 %vm710_vm4, %v1133_v57 }
 0x2bc   : > { %1620 = vmatmul.mubr.msk.bf16.vlgmr.msra.gmra.mrb[16].mxu0 %vm710_vm4, %v1134_v27 }
 0x2c7   : > { %v1613_v29 = vpop.f32.mrb[4].mxu1 }
 0x2c8   : > { %v1123_v1 = vadd.f32 %v1613_v29, %v1453_v15  ;;  %v1087_v24 = vpop.f32.mrb[5].mxu1 }
 0x2c9   : > { %v1121_v31 = vadd.f32 %v1453_v15, %v1087_v24  ;;  %v1614_v36 = vpop.f32.mrb[6].mxu1 }
 0x2ca   : > { %v1124_v43 = vadd.f32 %v1614_v36, %v1453_v15  ;;  %v1090_v47 = vpop.f32.mrb[7].mxu1  ;;  %v1131_v63 = vmax.f32 %v1123_v1, 0.0 }
 0x2cb   : > { %v1122_v50 = vadd.f32 %v1453_v15, %v1090_v47  ;;  %v1129_v35 = vmax.f32 %v1121_v31, 0.0 }
 0x2cc   : > { %v1132_v32 = vmax.f32 %v1124_v43, 0.0 }
 0x2cd   : > { %v1130_v56 = vmax.f32 %v1122_v50, 0.0 }
 0x2ce   : > { %v1136_v42 = vpack.c.bf16 %v1132_v32, %v1131_v63 }
 0x2cf   : > { %v1135_v60 = vpack.c.bf16 %v1130_v56, %v1129_v35 }
 0x2d1   : > { %1623 = vmatprep.mubr.msk.bf16.mxu0 %vm710_vm4, %v1135_v60 }
 0x2d2   : > { %1624 = vmatmul.mubr.msk.bf16.gmra.mrb[20].mxu0 %vm710_vm4, %v1136_v42 }
 0x38f   : > { %v1621_v37 = vpop.f32.mrb[16].mxu0 }
 0x390   : > { %v1215_v53 = vadd.f32 %v1621_v37, %v1454_v49  ;;  %v1206_v54 = vpop.f32.mrb[17].mxu0 }
 0x391   : > { %v1207_v59 = vadd.f32 %v1454_v49, %v1206_v54  ;;  %v1622_v58 = vpop.f32.mrb[18].mxu0 }
 0x392   : > { %v1248_v40 = vadd.f32 %v1215_v53, %v2178_v13  ;;  %v1218_v62 = vadd.f32 %v1622_v58, %v1454_v49  ;;  %v1209_v51 = vpop.f32.mrb[19].mxu0 }
 0x393   : > { %v1246_v0 = vadd.f32 %v1207_v59, %v2172_v11  ;;  %v1210_v3 = vadd.f32 %v1454_v49, %v1209_v51 }
 0x394   : > { %v1256_v5 = vmax.f32 %v1248_v40, 0.0  ;;  %v1249_v46 = vadd.f32 %v1218_v62, %v2181_v14 }
 0x395   : > { %v1254_v52 = vmax.f32 %v1246_v0, 0.0  ;;  %v1247_v6 = vadd.f32 %v1210_v3, %v2175_v12 }
 0x396   : > { %1264 = vst [vmem:[%s2577_s23 + $0x10] sm:$0xff] %v1256_v5  ;;  %v1257_v13 = vmax.f32 %v1249_v46, 0.0 }
 0x397   : > { %1262 = vst [vmem:[%s2577_s23] sm:$0xff] %v1254_v52  ;;  %v1255_v55 = vmax.f32 %v1247_v6, 0.0 }
 0x398   : > { %1265 = vst [vmem:[%s2577_s23 + $0x18] sm:$0xff] %v1257_v13 }
 0x399   : > { %1263 = vst [vmem:[%s2577_s23 + $0x8] sm:$0xff] %v1255_v55 }
 0x3a5   : > { %v1625_v11 = vpop.f32.mrb[20].mxu0 }
 0x3a6   : > { %v1231_v14 = vadd.f32 %v1625_v11, %v1454_v49  ;;  %v1222_v34 = vpop.f32.mrb[21].mxu0 }
 0x3a7   : > { %v1223_v12 = vadd.f32 %v1454_v49, %v1222_v34  ;;  %v1626_v28 = vpop.f32.mrb[22].mxu0 }
 0x3a8   : > { %v1252_v33 = vadd.f32 %v1231_v14, %v2194_v19  ;;  %v1234_v39 = vadd.f32 %v1626_v28, %v1454_v49  ;;  %v1225_v10 = vpop.f32.mrb[23].mxu0 }
 0x3a9   : > { %v1250_v44 = vadd.f32 %v1223_v12, %v2188_v17  ;;  %v1226_v61 = vadd.f32 %v1454_v49, %v1225_v10 }
 0x3aa   : > { %v1260_v30 = vmax.f32 %v1252_v33, 0.0  ;;  %v1253_v15 = vadd.f32 %v1234_v39, %v2197_v20 }
 0x3ab   : > { %v1258_v2 = vmax.f32 %v1250_v44, 0.0  ;;  %v1251_v19 = vadd.f32 %v1226_v61, %v2191_v18 }
 0x3ac   : > { %1268 = vst [vmem:[%s2577_s23 + $0x30] sm:$0xff] %v1260_v30  ;;  %v1261_v4 = vmax.f32 %v1253_v15, 0.0 }
 0x3ad   : > { %1266 = vst [vmem:[%s2577_s23 + $0x20] sm:$0xff] %v1258_v2  ;;  %v1259_v38 = vmax.f32 %v1251_v19, 0.0 }
 0x3ae   : > { %1269 = vst [vmem:[%s2577_s23 + $0x38] sm:$0xff] %v1261_v4 }
 0x3af   : > { %1267 = vst [vmem:[%s2577_s23 + $0x28] sm:$0xff] %v1259_v38 }
 0x3b0   : > { %1874 = shalt.err (!%p1871_p3)
}
 0x3b1   : > { %s1875_s20 = scalar_lea.hbm %s2597_s15, 1024  ;;  %s1879_s24 = scalar_lea.hbm %s2660_s7, 8192 }
 0x3b2   : > { %p1876_p5 = scmp.ne.s32.totalorder %s2597_s15, %s1875_s20  ;;  %p1880_p2 = scmp.lt.u32.totalorder %s2597_s15, %s2660_s7 }
 0x3b3   : > { %p1881_p4 = scmp.lt.u32.totalorder %s1879_s24, %s1875_s20  ;;  %p1883_p8 = scmp.lt.u32.totalorder %s1875_s20, %s2597_s15 }
 0x3b4   : > { %p1877_p6 = pnand %p1876_p5, %p2689_p9 }
 0x3b5   : > { %p1882_p10 = por %p1881_p4, %p1880_p2 }
 0x3b6   : > { %p1878_p7 = pneg %p1877_p6 }
 0x3b7   : > { %p1884_p12 = por %p1883_p8, %p1882_p10 }
 0x3b9   : > { %p1885_p0 = pnand %p1884_p12, %p1878_p7 }
 0x3bb   : > { %1888 = shalt.err (!%p1885_p0)
}
 0x3bc   : > { %s1967_s27 = smov 128   ;;  %s1968_s28 = smov 8  }
 0x3bd   : > { %1661 = dma.vmem_to_hbm [thread:$0]  (%p2689_p9), %s2589_s18, 1024, %s2597_s15, %s1271_s21, %s1967_s27, %s1967_s27, %s1968_s28  }
 0x3be PF: > { %s2690_s13 = sld [smem:[#allocation8_spill]]  ;;  %s2691_s10 = sld [smem:[#allocation12_spill]] }
 0x3bf   : > { %p1672_p11 = scmp.ge.s32.totalorder %s1959_s8, 2 }
 0x3c4   : > { %s1302_s16 = sand.u32 1, %s2690_s13   ;;  %p2692_p13 = scmp.ne.s32.totalorder %s2691_s10, 0 }
 0x3c5   : > { %s1303_s14 = scalar_lea.sflag [#allocation4], %s1302_s16 }
 0x3c6   : > { %p1668_p1 = pnand %p1672_p11, %p2692_p13 }
 0x3c8   : > { %1926 = dma.done.wait (!%p1668_p1), %s1303_s14, 1024  }
 0x3c9   : > { %1928 = vsyncadd (!%p1668_p1), %s1303_s14, 4294966272  ;;  %s23_s8 = sadd.s32 1, %s1959_s8   ;;  %s2693_s27 = sld [smem:[#allocation9_spill]] }
 0x3ca   : > { %p20_p3 = scmp.ge.s32.totalorder %s23_s8, 10   ;;  %s2694_s29 = sld [smem:[#allocation10_spill]] }
 0x3cb   : > { %s2695_s17 = sld [smem:[#allocation11_spill]]  ;;  %s2696_s24 = smov %s1935_s25 }
 0x3cc   : > { %s2697_s25 = smov %s1939_s26  ;;  %s2698_s26 = smov %s2087_s22 }
 0x3cd   : > { %s2699_s28 = smov %s1955_s30  ;;  %22 = sbr.rel (!%p20_p3) target bundleno = 7 (0x7), region = 96 }
 0x3d1   : > { %s2700_s30 = smov %s2695_s17 }
 0x3d4   :  { %1308 = vsyncpa [#allocation3], 1 }
 0x3d5   :  { %1310 = vsyncpa [#allocation3 + $0x1], 1 }
 0x3d6   :  { %1311 = vsyncpa [#allocation4], 1 }
 0x3d7   :  { %1313 = vsyncpa [#allocation4 + $0x1], 1 }

</bundles_post_ra>
